<compile_context>
chip_gen: v6e
topology: v6e:2x2x1
jax: 0.10.0
libtpu: 0.0.40
codegen_flags: <defaults>
</compile_context>

<pallas_src>
import functools
import math

import jax
import jax.numpy as jnp
from jax import lax
from jax.experimental import pallas as pl
from jax.experimental.pallas import tpu as pltpu


# ---------------------------------------------------------------------------
# Fused kernel:  y = x @ W_qkv + b_qkv ;  out = MHSA(y)         (per image)
# ---------------------------------------------------------------------------
def _fused_qkv_attn_kernel(x_ref, w_ref, b_ref, o_ref, *, num_heads, head_dim):
    # x_ref: (S, H)   w_ref: (H, 3H)   b_ref: (1, 3H)   o_ref: (S, H)
    H = num_heads * head_dim
    scale = 1.0 / math.sqrt(head_dim)

    # One wide MXU matmul for Q, K and V at once; accumulate in f32.
    y = jnp.dot(x_ref[...], w_ref[...],
                preferred_element_type=jnp.float32) + b_ref[...]

    ctxs = []
    for h in range(num_heads):                      # trace-time unrolled
        lo = h * head_dim
        q = y[:, lo:lo + head_dim] * scale          # fold 1/sqrt(D) into q
        k = y[:, H + lo:H + lo + head_dim]
        v = y[:, 2 * H + lo:2 * H + lo + head_dim]
        # QK^T without transposing K: contract the last dim of both operands.
        s = lax.dot_general(q, k, (((1,), (1,)), ((), ())),
                            preferred_element_type=jnp.float32)
        s = s - jnp.max(s, axis=-1, keepdims=True)
        e = jnp.exp(s)
        p = e * pl.reciprocal(jnp.sum(e, axis=-1, keepdims=True), approx=True)
        # TODO(synk): nn.Dropout on attention_probs is identity in eval mode
        # and head_mask is None in the default forward path; neither applied.
        ctxs.append(jnp.dot(p, v, preferred_element_type=jnp.float32))

    out = ctxs[0] if num_heads == 1 else jnp.concatenate(ctxs, axis=-1)
    o_ref[...] = out.astype(o_ref.dtype)            # single lane-dense store


def fused_self_attention(x, w_qkv, b_qkv, num_heads, head_dim):
    # x: (B, S, H) with H = num_heads * head_dim.
    B, S, H = x.shape
    three_h = w_qkv.shape[1]
    kernel = functools.partial(_fused_qkv_attn_kernel,
                               num_heads=num_heads, head_dim=head_dim)
    # NOTE: one image's activations + the (H, 3H) weight comfortably fit the
    # default 32 MiB scoped VMEM at ViT-Base/Large sizes (S~197, H<=1280).
    # TODO(synk): for very long sequences, split into a token-tiled QKV
    # projection kernel + a separate attention kernel instead.
    return pl.pallas_call(
        kernel,
        out_shape=jax.ShapeDtypeStruct((B, S, H), x.dtype),
        grid_spec=pltpu.PrefetchScalarGridSpec(
            num_scalar_prefetch=0,
            grid=(B,),
            in_specs=[
                pl.BlockSpec((None, S, H), lambda b: (b, 0, 0)),
                pl.BlockSpec((H, three_h), lambda b: (0, 0)),   # VMEM-resident
                pl.BlockSpec((1, three_h), lambda b: (0, 0)),   # VMEM-resident
            ],
            out_specs=pl.BlockSpec((None, S, H), lambda b: (b, 0, 0)),
        ),
        compiler_params=pltpu.CompilerParams(
            dimension_semantics=("parallel",)),
    )(x, w_qkv, b_qkv)


# ---------------------------------------------------------------------------
# Module wrapper (host-side one-time weight fuse/transpose; no runtime glue)
# ---------------------------------------------------------------------------
class QuantViTSelfAttentionPallas:
    def __init__(self, hidden_size, num_attention_heads, key):
        assert hidden_size % num_attention_heads == 0
        self.num_attention_heads = num_attention_heads
        self.attention_head_size = hidden_size // num_attention_heads
        self.all_head_size = hidden_size
        ks = jax.random.split(key, 6)
        scale = 1.0 / math.sqrt(hidden_size)
        # nn.Linear layout: weight (out_features, in_features), bias (out,)
        self.wq = jax.random.normal(ks[0], (hidden_size, hidden_size), jnp.float32) * scale
        self.bq = jax.random.normal(ks[1], (hidden_size,), jnp.float32) * scale
        self.wk = jax.random.normal(ks[2], (hidden_size, hidden_size), jnp.float32) * scale
        self.bk = jax.random.normal(ks[3], (hidden_size,), jnp.float32) * scale
        self.wv = jax.random.normal(ks[4], (hidden_size, hidden_size), jnp.float32) * scale
        self.bv = jax.random.normal(ks[5], (hidden_size,), jnp.float32) * scale
        # Host-side fuse + transpose -> (H, 3H): the kernel does a single
        # x @ W matmul with no in-kernel weight transpose.
        self.w_qkv = jnp.concatenate([self.wq, self.wk, self.wv], axis=0).T
        self.b_qkv = jnp.concatenate([self.bq, self.bk, self.bv]).reshape(1, 3 * hidden_size)
        # TODO(synk): QuantLinear fake-quant paths (use_weight_quant /
        # use_act_quant) default to False in the module -> plain fp linear.

    def __call__(self, hidden_states):
        ctx = fused_self_attention(hidden_states, self.w_qkv, self.b_qkv,
                                   self.num_attention_heads,
                                   self.attention_head_size)   # (B, S, H)
        return (ctx,)


# ---------------------------------------------------------------------------
# Pure-JAX reference for sanity checking
# ---------------------------------------------------------------------------
def _reference(mod, x):
    B, S, H = x.shape
    nH, D = mod.num_attention_heads, mod.attention_head_size
    q = x @ mod.wq.T + mod.bq
    k = x @ mod.wk.T + mod.bk
    v = x @ mod.wv.T + mod.bv
    q = q.reshape(B, S, nH, D).transpose(0, 2, 1, 3)
    k = k.reshape(B, S, nH, D).transpose(0, 2, 1, 3)
    v = v.reshape(B, S, nH, D).transpose(0, 2, 1, 3)
    s = jnp.einsum("bhqd,bhkd->bhqk", q, k) / math.sqrt(D)
    p = jax.nn.softmax(s, axis=-1)
    ctx = jnp.einsum("bhqk,bhkd->bhqd", p, v)
    return ctx.transpose(0, 2, 1, 3).reshape(B, S, H)


if __name__ == "__main__":
    B, S, H, nH = 2, 8, 32, 4
    key = jax.random.PRNGKey(0)
    k_param, k_x = jax.random.split(key)
    mod = QuantViTSelfAttentionPallas(H, nH, k_param)
    x = jax.random.normal(k_x, (B, S, H), jnp.float32)

    (out,) = mod(x)
    out = jax.block_until_ready(out)

    ref = _reference(mod, x)
    assert out.shape == (B, S, H), out.shape
    # approx EUP reciprocal in the softmax denominator -> slightly looser tol.
    assert jnp.allclose(out, ref, atol=2e-3, rtol=2e-3), \
        float(jnp.max(jnp.abs(out - ref)))
    print("KERNEL_OK")
</pallas_src>

<mosaic_0001>
module attributes {stable_mosaic.version = 11 : i64} {
  func.func @_fused_qkv_attn_kernel(%arg0: i32, %arg1: memref<1x8x32xf32, #tpu.memory_space<vmem>>, %arg2: memref<32x96xf32, #tpu.memory_space<vmem>>, %arg3: memref<1x96xf32, #tpu.memory_space<vmem>>, %arg4: memref<1x8x32xf32, #tpu.memory_space<vmem>>) attributes {dimension_semantics = [#tpu.dimension_semantics<parallel>], iteration_bounds = array<i64: 2>, scalar_prefetch = 0 : i64, scratch_operands = 0 : i64, tpu.core_type = #tpu.core_type<tc>, window_params = [{transform_indices = @transform_0, window_bounds = array<i64: 1, 8, 32>}, {pipeline_mode = #tpu.pipeline_mode<synchronous>, transform_indices = @transform_1, window_bounds = array<i64: 32, 96>}, {pipeline_mode = #tpu.pipeline_mode<synchronous>, transform_indices = @transform_2, window_bounds = array<i64: 1, 96>}, {transform_indices = @transform_3, window_bounds = array<i64: 1, 8, 32>}]} {
    %c0 = arith.constant 0 : index
    %c0_0 = arith.constant 0 : index
    %c0_1 = arith.constant 0 : index
    %0 = vector.load %arg1[%c0, %c0_0, %c0_1] : memref<1x8x32xf32, #tpu.memory_space<vmem>>, vector<1x8x32xf32>
    %1 = vector.shape_cast %0 : vector<1x8x32xf32> to vector<8x32xf32>
    %c0_2 = arith.constant 0 : index
    %c0_3 = arith.constant 0 : index
    %2 = vector.load %arg2[%c0_2, %c0_3] : memref<32x96xf32, #tpu.memory_space<vmem>>, vector<32x96xf32>
    %cst = arith.constant dense<0.000000e+00> : vector<8x96xf32>
    %3 = tpu.matmul %1, %2, %cst {dimension_numbers = #tpu.dot_dimension_numbers<[1], [0], [0], [1], [0, 0, 1, 1], [], []>} : vector<8x32xf32>, vector<32x96xf32>, vector<8x96xf32> -> vector<8x96xf32>
    %c0_4 = arith.constant 0 : index
    %c0_5 = arith.constant 0 : index
    %4 = vector.load %arg3[%c0_4, %c0_5] : memref<1x96xf32, #tpu.memory_space<vmem>>, vector<1x96xf32>
    %5 = vector.broadcast %4 : vector<1x96xf32> to vector<8x96xf32>
    %6 = arith.addf %3, %5 : vector<8x96xf32>
    %7 = vector.extract_strided_slice %6 {offsets = [0, 0], sizes = [8, 8], strides = [1, 1]} : vector<8x96xf32> to vector<8x8xf32>
    %cst_6 = arith.constant 0.353553385 : f32
    %8 = vector.broadcast %cst_6 : f32 to vector<8x8xf32>
    %9 = arith.mulf %7, %8 : vector<8x8xf32>
    %10 = vector.extract_strided_slice %6 {offsets = [0, 32], sizes = [8, 8], strides = [1, 1]} : vector<8x96xf32> to vector<8x8xf32>
    %11 = vector.extract_strided_slice %6 {offsets = [0, 64], sizes = [8, 8], strides = [1, 1]} : vector<8x96xf32> to vector<8x8xf32>
    %cst_7 = arith.constant dense<0.000000e+00> : vector<8x8xf32>
    %12 = tpu.matmul %9, %10, %cst_7 {dimension_numbers = #tpu.dot_dimension_numbers<[1], [1], [0], [0], [0, 0, 1, 0], [], []>} : vector<8x8xf32>, vector<8x8xf32>, vector<8x8xf32> -> vector<8x8xf32>
    %cst_8 = arith.constant dense<0xFF800000> : vector<8xf32>
    %13 = vector.multi_reduction <maximumf>, %12, %cst_8 [1] : vector<8x8xf32> to vector<8xf32>
    %14 = vector.shape_cast %13 : vector<8xf32> to vector<8x1xf32>
    %15 = vector.broadcast %14 : vector<8x1xf32> to vector<8x8xf32>
    %16 = arith.subf %12, %15 : vector<8x8xf32>
    %17 = math.exp %16 : vector<8x8xf32>
    %cst_9 = arith.constant dense<0.000000e+00> : vector<8xf32>
    %18 = vector.multi_reduction <add>, %17, %cst_9 [1] : vector<8x8xf32> to vector<8xf32>
    %19 = vector.shape_cast %18 : vector<8xf32> to vector<8x1xf32>
    %20 = tpu.reciprocal %19 {approx = true} : vector<8x1xf32> -> vector<8x1xf32>
    %21 = vector.broadcast %20 : vector<8x1xf32> to vector<8x8xf32>
    %22 = arith.mulf %17, %21 : vector<8x8xf32>
    %cst_10 = arith.constant dense<0.000000e+00> : vector<8x8xf32>
    %23 = tpu.matmul %22, %11, %cst_10 {dimension_numbers = #tpu.dot_dimension_numbers<[1], [0], [0], [1], [0, 0, 1, 1], [], []>} : vector<8x8xf32>, vector<8x8xf32>, vector<8x8xf32> -> vector<8x8xf32>
    %24 = vector.extract_strided_slice %6 {offsets = [0, 8], sizes = [8, 8], strides = [1, 1]} : vector<8x96xf32> to vector<8x8xf32>
    %cst_11 = arith.constant 0.353553385 : f32
    %25 = vector.broadcast %cst_11 : f32 to vector<8x8xf32>
    %26 = arith.mulf %24, %25 : vector<8x8xf32>
    %27 = vector.extract_strided_slice %6 {offsets = [0, 40], sizes = [8, 8], strides = [1, 1]} : vector<8x96xf32> to vector<8x8xf32>
    %28 = vector.extract_strided_slice %6 {offsets = [0, 72], sizes = [8, 8], strides = [1, 1]} : vector<8x96xf32> to vector<8x8xf32>
    %cst_12 = arith.constant dense<0.000000e+00> : vector<8x8xf32>
    %29 = tpu.matmul %26, %27, %cst_12 {dimension_numbers = #tpu.dot_dimension_numbers<[1], [1], [0], [0], [0, 0, 1, 0], [], []>} : vector<8x8xf32>, vector<8x8xf32>, vector<8x8xf32> -> vector<8x8xf32>
    %cst_13 = arith.constant dense<0xFF800000> : vector<8xf32>
    %30 = vector.multi_reduction <maximumf>, %29, %cst_13 [1] : vector<8x8xf32> to vector<8xf32>
    %31 = vector.shape_cast %30 : vector<8xf32> to vector<8x1xf32>
    %32 = vector.broadcast %31 : vector<8x1xf32> to vector<8x8xf32>
    %33 = arith.subf %29, %32 : vector<8x8xf32>
    %34 = math.exp %33 : vector<8x8xf32>
    %cst_14 = arith.constant dense<0.000000e+00> : vector<8xf32>
    %35 = vector.multi_reduction <add>, %34, %cst_14 [1] : vector<8x8xf32> to vector<8xf32>
    %36 = vector.shape_cast %35 : vector<8xf32> to vector<8x1xf32>
    %37 = tpu.reciprocal %36 {approx = true} : vector<8x1xf32> -> vector<8x1xf32>
    %38 = vector.broadcast %37 : vector<8x1xf32> to vector<8x8xf32>
    %39 = arith.mulf %34, %38 : vector<8x8xf32>
    %cst_15 = arith.constant dense<0.000000e+00> : vector<8x8xf32>
    %40 = tpu.matmul %39, %28, %cst_15 {dimension_numbers = #tpu.dot_dimension_numbers<[1], [0], [0], [1], [0, 0, 1, 1], [], []>} : vector<8x8xf32>, vector<8x8xf32>, vector<8x8xf32> -> vector<8x8xf32>
    %41 = vector.extract_strided_slice %6 {offsets = [0, 16], sizes = [8, 8], strides = [1, 1]} : vector<8x96xf32> to vector<8x8xf32>
    %cst_16 = arith.constant 0.353553385 : f32
    %42 = vector.broadcast %cst_16 : f32 to vector<8x8xf32>
    %43 = arith.mulf %41, %42 : vector<8x8xf32>
    %44 = vector.extract_strided_slice %6 {offsets = [0, 48], sizes = [8, 8], strides = [1, 1]} : vector<8x96xf32> to vector<8x8xf32>
    %45 = vector.extract_strided_slice %6 {offsets = [0, 80], sizes = [8, 8], strides = [1, 1]} : vector<8x96xf32> to vector<8x8xf32>
    %cst_17 = arith.constant dense<0.000000e+00> : vector<8x8xf32>
    %46 = tpu.matmul %43, %44, %cst_17 {dimension_numbers = #tpu.dot_dimension_numbers<[1], [1], [0], [0], [0, 0, 1, 0], [], []>} : vector<8x8xf32>, vector<8x8xf32>, vector<8x8xf32> -> vector<8x8xf32>
    %cst_18 = arith.constant dense<0xFF800000> : vector<8xf32>
    %47 = vector.multi_reduction <maximumf>, %46, %cst_18 [1] : vector<8x8xf32> to vector<8xf32>
    %48 = vector.shape_cast %47 : vector<8xf32> to vector<8x1xf32>
    %49 = vector.broadcast %48 : vector<8x1xf32> to vector<8x8xf32>
    %50 = arith.subf %46, %49 : vector<8x8xf32>
    %51 = math.exp %50 : vector<8x8xf32>
    %cst_19 = arith.constant dense<0.000000e+00> : vector<8xf32>
    %52 = vector.multi_reduction <add>, %51, %cst_19 [1] : vector<8x8xf32> to vector<8xf32>
    %53 = vector.shape_cast %52 : vector<8xf32> to vector<8x1xf32>
    %54 = tpu.reciprocal %53 {approx = true} : vector<8x1xf32> -> vector<8x1xf32>
    %55 = vector.broadcast %54 : vector<8x1xf32> to vector<8x8xf32>
    %56 = arith.mulf %51, %55 : vector<8x8xf32>
    %cst_20 = arith.constant dense<0.000000e+00> : vector<8x8xf32>
    %57 = tpu.matmul %56, %45, %cst_20 {dimension_numbers = #tpu.dot_dimension_numbers<[1], [0], [0], [1], [0, 0, 1, 1], [], []>} : vector<8x8xf32>, vector<8x8xf32>, vector<8x8xf32> -> vector<8x8xf32>
    %58 = vector.extract_strided_slice %6 {offsets = [0, 24], sizes = [8, 8], strides = [1, 1]} : vector<8x96xf32> to vector<8x8xf32>
    %cst_21 = arith.constant 0.353553385 : f32
    %59 = vector.broadcast %cst_21 : f32 to vector<8x8xf32>
    %60 = arith.mulf %58, %59 : vector<8x8xf32>
    %61 = vector.extract_strided_slice %6 {offsets = [0, 56], sizes = [8, 8], strides = [1, 1]} : vector<8x96xf32> to vector<8x8xf32>
    %62 = vector.extract_strided_slice %6 {offsets = [0, 88], sizes = [8, 8], strides = [1, 1]} : vector<8x96xf32> to vector<8x8xf32>
    %cst_22 = arith.constant dense<0.000000e+00> : vector<8x8xf32>
    %63 = tpu.matmul %60, %61, %cst_22 {dimension_numbers = #tpu.dot_dimension_numbers<[1], [1], [0], [0], [0, 0, 1, 0], [], []>} : vector<8x8xf32>, vector<8x8xf32>, vector<8x8xf32> -> vector<8x8xf32>
    %cst_23 = arith.constant dense<0xFF800000> : vector<8xf32>
    %64 = vector.multi_reduction <maximumf>, %63, %cst_23 [1] : vector<8x8xf32> to vector<8xf32>
    %65 = vector.shape_cast %64 : vector<8xf32> to vector<8x1xf32>
    %66 = vector.broadcast %65 : vector<8x1xf32> to vector<8x8xf32>
    %67 = arith.subf %63, %66 : vector<8x8xf32>
    %68 = math.exp %67 : vector<8x8xf32>
    %cst_24 = arith.constant dense<0.000000e+00> : vector<8xf32>
    %69 = vector.multi_reduction <add>, %68, %cst_24 [1] : vector<8x8xf32> to vector<8xf32>
    %70 = vector.shape_cast %69 : vector<8xf32> to vector<8x1xf32>
    %71 = tpu.reciprocal %70 {approx = true} : vector<8x1xf32> -> vector<8x1xf32>
    %72 = vector.broadcast %71 : vector<8x1xf32> to vector<8x8xf32>
    %73 = arith.mulf %68, %72 : vector<8x8xf32>
    %cst_25 = arith.constant dense<0.000000e+00> : vector<8x8xf32>
    %74 = tpu.matmul %73, %62, %cst_25 {dimension_numbers = #tpu.dot_dimension_numbers<[1], [0], [0], [1], [0, 0, 1, 1], [], []>} : vector<8x8xf32>, vector<8x8xf32>, vector<8x8xf32> -> vector<8x8xf32>
    %75 = tpu.concatenate %23, %40, %57, %74 in 1 : vector<8x8xf32>, vector<8x8xf32>, vector<8x8xf32>, vector<8x8xf32> -> vector<8x32xf32>
    %c0_26 = arith.constant 0 : index
    %c0_27 = arith.constant 0 : index
    %c0_28 = arith.constant 0 : index
    %76 = vector.load %arg4[%c0_26, %c0_27, %c0_28] : memref<1x8x32xf32, #tpu.memory_space<vmem>>, vector<1x8x32xf32>
    %77 = vector.shape_cast %76 : vector<1x8x32xf32> to vector<8x32xf32>
    %78 = vector.shape_cast %75 : vector<8x32xf32> to vector<1x8x32xf32>
    tpu.vector_store %arg4[%c0_26, %c0_27, %c0_28], %78 {strides = array<i32>} : memref<1x8x32xf32, #tpu.memory_space<vmem>>, vector<1x8x32xf32>,
    return
  }
  func.func @transform_0(%arg0: i32) -> (i32, i32, i32) {
    %c0_i32 = arith.constant 0 : i32
    %c0_i32_0 = arith.constant 0 : i32
    %c0_i32_1 = arith.constant 0 : i32
    return %arg0, %c0_i32, %c0_i32_0 : i32, i32, i32
  }
  func.func @transform_1(%arg0: i32) -> (i32, i32) {
    %c0_i32 = arith.constant 0 : i32
    %c0_i32_0 = arith.constant 0 : i32
    %c0_i32_1 = arith.constant 0 : i32
    return %c0_i32, %c0_i32_0 : i32, i32
  }
  func.func @transform_2(%arg0: i32) -> (i32, i32) {
    %c0_i32 = arith.constant 0 : i32
    %c0_i32_0 = arith.constant 0 : i32
    %c0_i32_1 = arith.constant 0 : i32
    return %c0_i32, %c0_i32_0 : i32, i32
  }
  func.func @transform_3(%arg0: i32) -> (i32, i32, i32) {
    %c0_i32 = arith.constant 0 : i32
    %c0_i32_0 = arith.constant 0 : i32
    %c0_i32_1 = arith.constant 0 : i32
    return %arg0, %c0_i32, %c0_i32_0 : i32, i32, i32
  }
}

</mosaic_0001>

<bundles_post_ra>
// kernel: tpu_custom_call.1
= control target key start
LH: loop header
LB: loop body
LE: loop exit
PB: predicated region body
PF: predicated region fallthrough
CT: control target
= control target key end

     0   :  { %8 = vsyncpa [#allocation3], 0  ;;  %s1648_s0 = inlined_call_operand.hbm [shape: f32[2,8,32], index: 0, kind: input, shape index: {}]   ;;  %s1649_s1 = inlined_call_operand.hbm [shape: f32[32,96], index: 1, kind: input, shape index: {}]   ;;  %s1650_s2 = inlined_call_operand.vmem [shape: f32[1,96], index: 2, kind: input, shape index: {}]   ;;  %s1651_s3 = inlined_call_operand.hbm [shape: f32[2,8,32], index: 3, kind: output, shape index: {}]  }
   0x1   :  { %10 = vsyncpa [#allocation3 + $0x1], 0 }
   0x2   :  { %11 = vsyncpa [#allocation6], 0 }
   0x3   :  { %12 = vsyncpa [#allocation4], 0 }
   0x4   :  { %14 = vsyncpa [#allocation4 + $0x1], 0  ;;  %s1417_s12 = smov 0   ;;  %s1419_s13 = smov 0  }
   0x5   :  { %s1421_s14 = smov 0   ;;  %s1423_s15 = smov 0  }
   0x6 LB: > { %s1438_s16 = sadd.s32 4294967295, %s1374_s15   ;;  %s1061_s17 = sadd.s32 4294967294, %s1374_s15   ;;  %s1374_s15 = sphi %s1423_s15, %s1673_s15   ;;  %s1370_s14 = sphi %s1421_s14, %s1672_s14   ;;  %s1366_s13 = sphi %s1419_s13, %s1671_s13   ;;  %s1362_s12 = sphi %s1417_s12, %s1670_s12  }
   0x7   : > { %p40_p0 = scmp.ne.s32.totalorder %s1366_s13, %s1362_s12  ;;  %p1652_p1 = scmp.eq.s32.totalorder %s1438_s16, 0 }
   0x8   : > { %p112_p3 = scmp.eq.s32.totalorder %s1061_s17, 1  ;;  %p1062_p5 = scmp.ge.s32.totalorder %s1374_s15, 1 }
   0x9   : > { %p1447_p4 = por %p1652_p1, %p40_p0  ;;  %p119_p7 = scmp.lt.s32.totalorder %s1374_s15, 3 }
   0xa   : > { %p1452_p6 = por %p112_p3, %p40_p0  ;;  %s1376_s21 = smov [#allocation5]  }
   0xb   : > { %s1656_s18 = scalar_select %p1447_p4, 1, 0 }
   0xc   : > { %s1657_s19 = scalar_select %p1452_p6, 1, 0 }
   0xd   : > { %p1457_p8 = pnand %p1062_p5, %p119_p7  ;;  %s131_s22 = sshll.u32 %s1376_s21, 4  ;;  %s132_s22 = int_to_ptr.vmem [resolvable:$true] %s131_s22 }
   0xe   : > { %s1471_s24 = sadd.s32 1, %s1374_s15   ;;  %s27_s25 = sadd.s32 1, %s1370_s14 }
   0xf   : > { %s1658_s20 = scalar_select %p1457_p8, 1, 0 }
  0x10   : > { %p1169_p9 = pneg %p1457_p8  ;;  %s24_s26 = ssub.s32 %s1374_s15, %s1471_s24 }
  0x11   : > { %s1263_s27 = scalar_lea.vmem %s132_s22, 512  ;;  %p1271_p5 = scmp.lt.s32.totalorder %s132_s22, %s132_s22 }
  0x12   : > { %p1466_p11 = pnand %p1169_p9, %p1652_p1  ;;  %p1264_p13 = scmp.ne.s32.totalorder %s132_s22, %s1263_s27 }
  0x13   : > { %p1272_p7 = scmp.lt.s32.totalorder %s1263_s27, %s1263_s27 }
  0x14   : > { %p1254_p12 = pneg %p1466_p11 }
  0x15   : > { %p1273_p10 = por %p1272_p7, %p1271_p5 }
  0x16   : > { %p1266_p0 = pnand %p1264_p13, %p1254_p12 }
  0x18   : > { %p1267_p3 = pneg %p1266_p0 }
  0x1a   : > { %p1274_p2 = pnand %p1273_p10, %p1267_p3 }
  0x1c   : > { %1277 = shalt.err (!%p1274_p2)
}
  0x1d   : > { %s1377_s28 = smov 128   ;;  %s1378_s29 = smov 8  }
  0x1e   : > { %1172 = dma.hbm_to_vmem [thread:$0]  (!%p1466_p11), %s1649_s1, 512, %s132_s22, [#allocation6], %s1377_s28, %s1377_s28, %s1378_s29  }
  0x1f   : > { %p25_p9 = scmp.eq.s32.totalorder %s24_s26, 0  ;;  %p34_p12 = scmp.ne.s32.totalorder %s1370_s14, %s1366_s13 }
  0x20   : > { %p35_p10 = scmp.eq.s32.totalorder %s1374_s15, 0  ;;  %p1182_p2 = scmp.lt.s32.totalorder %s1374_s15, 2 }
  0x21   : > { %s1488_s5 = scalar_select %p25_p9, %s1370_s14, %s27_s25  }
  0x22   : > { %p36_p13 = por %p35_p10, %p34_p12  ;;  %p1660_p0 = scmp.eq.s32.totalorder %s1438_s16, 1 }
  0x23   : > { %s148_s7 = sand.u32 1, %s1370_s14   ;;  %s1066_s8 = sshll.u32 %s1374_s15, 7 }
  0x24   : > { %p1492_p3 = por %p1660_p0, %p34_p12  ;;  %s1065_s9 = sshll.u32 %s148_s7, 3 }
  0x25   : > { %s1501_s17 = scalar_lea.hbm %s1648_s0, %s1066_s8  ;;  %s152_s21 = scalar_lea.vmem [#allocation2], %s1065_s9 }
  0x26   : > { %s1661_s6 = scalar_select %p1492_p3, 1, 0 }
  0x27   : > { %s159_s22 = sshll.u32 %s152_s21, 4  ;;  %p1503_p11 = pnand %p1182_p2, %p36_p13  ;;  %s160_s22 = int_to_ptr.vmem [resolvable:$true] %s159_s22 }
  0x28   : > { %s149_s25 = scalar_lea.sflag [#allocation3], %s148_s7  ;;  %s1278_s26 = scalar_lea.hbm %s1501_s17, 128 }
  0x29   : > { %p1279_p5 = scmp.ne.s32.totalorder %s1501_s17, %s1278_s26  ;;  %p1280_p7 = pneg %p1503_p11 }
  0x2a   : > { %s1283_s29 = scalar_lea.hbm %s1648_s0, 256  ;;  %p1284_p10 = scmp.lt.s32.totalorder %s1501_s17, %s1648_s0 }
  0x2b   : > { %p1281_p9 = pnand %p1280_p7, %p1279_p5  ;;  %p1285_p2 = scmp.lt.s32.totalorder %s1283_s29, %s1278_s26 }
  0x2d   : > { %p1282_p12 = pneg %p1281_p9  ;;  %p1286_p13 = por %p1285_p2, %p1284_p10 }
  0x2f   : > { %p1287_p0 = pnand %p1286_p13, %p1282_p12 }
  0x31   : > { %1290 = shalt.err (!%p1287_p0)
}
  0x32   : > { %s1291_s8 = scalar_lea.vmem %s160_s22, 128  ;;  %s1379_s7 = smov [#allocation2]  }
  0x33   : > { %p1292_p1 = scmp.ne.s32.totalorder %s160_s22, %s1291_s8  ;;  %s1296_s9 = sshll.u32 %s1379_s7, 4  ;;  %s1297_s9 = int_to_ptr.vmem [resolvable:$false] %s1296_s9 }
  0x34   : > { %s1298_s10 = scalar_lea.vmem %s1297_s9, 256  ;;  %p1299_p5 = scmp.lt.s32.totalorder %s160_s22, %s1297_s9 }
  0x35   : > { %p1294_p6 = pnand %p1292_p1, %p1280_p7  ;;  %p1300_p9 = scmp.lt.s32.totalorder %s1298_s10, %s1291_s8 }
  0x37   : > { %p1295_p3 = pneg %p1294_p6  ;;  %p1301_p4 = por %p1300_p9, %p1299_p5 }
  0x39   : > { %p1302_p8 = pnand %p1301_p4, %p1295_p3 }
  0x3b   : > { %1305 = shalt.err (!%p1302_p8)
}
  0x3c   : > { %1176 = dma.hbm_to_vmem [thread:$0]  (!%p1503_p11), %s1501_s17, 128, %s160_s22, %s149_s25  }
  0x3d   : > { %p1663_p12 = scmp.ne.s32.totalorder %s1658_s20, 0 }
  0x3e   : > { %s1524_s11 = sand.u32 (!%p1663_p12), 1, %s1366_s13   ;;  %p1664_p1 = scmp.ne.s32.totalorder (!%p1663_p12), %s1656_s18, 0 }
  0x3f   : > { %168 = sbr.rel (%p1663_p12) target bundleno = 1279 (0x4ff), region = 32  ;;  %s1068_s21 = sshll.u32 (!%p1663_p12), %s1524_s11, 3 }
  0x40   : > { %s171_s26 = scalar_lea.sflag (!%p1663_p12), [#allocation3], %s1524_s11  ;;  %s174_s27 = scalar_lea.vmem (!%p1663_p12), [#allocation2], %s1068_s21 }
  0x44   : > { %1349 = dma.done.wait (%p1664_p1), %s171_s26, 128  }
  0x45   : > { %1351 = vsyncadd (%p1664_p1), %s171_s26, 4294967168  ;;  %p1665_p4 = scmp.eq.s32.totalorder %s1438_s16, 0 }
  0x47   : > { %1353 = dma.done.wait (%p1665_p4), [#allocation6], 512   ;;  %p1666_p6 = pmov %p1665_p4 }
  0x48   : > { %v1380_v0 = vmov 0.0   ;;  %vm1381_vm0 = vmmov 0   ;;  %v205_v1 = vld [vmem:[#allocation5 + $0x18] sm:$0xff]  ;;  %v204_v2 = vld [vmem:[#allocation5 + $0x10] sm:$0xff]  ;;  %v203_v3 = vld [vmem:[#allocation5 + $0x8] sm:$0xff]  ;;  %vm213_vm1 = vcmask 261120  }
  0x49   : > { %1355 = vsyncadd (%p1666_p6), [#allocation6], 4294966784  ;;  %1110 = vmatprep.subr.mxu0 %v1380_v0  ;;  %1118 = vmatprep.mubr.msk.f32.mxu0 %vm1381_vm0, %v1380_v0  ;;  %v202_v4 = vld [vmem:[#allocation5] sm:$0xff]  ;;  %v201_v5 = vld [vmem:[%s174_s27] sm:$0xff]  ;;  %s1382_s17 = smov 96   ;;  %s1383_s22 = smov 120  }
  0x4a   : > { %1121 = vmatprep.subr.mxu1 %v1380_v0  ;;  %1123 = vmatprep.mubr.msk.f32.mxu1 %vm1381_vm0, %v1380_v0  ;;  %v1071_v6 = vld [vmem:[%s1650_s2] ss:$0 sm:$0xff]  ;;  %s1384_s23 = smov 88   ;;  %s1385_s25 = smov 80   ;;  %vm291_vm2 = vcmask 64512   ;;  %vm962_vm3 = vcmask 130048  }
  0x4b   : > { %1111 = vmatpush3.msra.mxu0 %v205_v1  ;;  %s1386_s28 = smov 112   ;;  %s1387_s29 = smov 72   ;;  %vm964_vm4 = vcmask 195584  }
  0x4c   : > { %1112 = vmatprep.subr.mxu0 %v1380_v0  ;;  %s1388_s30 = smov 104   ;;  %s1389_s4 = smov 56  }
  0x4d   : > { %1113 = vmatpush3.msra.mxu0 %v204_v2  ;;  %s1390_s8 = smov 64   ;;  %s1391_s7 = smov 48  }
  0x4e   : > { %1114 = vmatprep.subr.mxu0 %v1380_v0  ;;  %s1392_s9 = smov 40   ;;  %s1393_s10 = smov 8  }
  0x4f   : > { %1115 = vmatpush3.msra.mxu0 %v203_v3  ;;  %s1394_s26 = smov 16   ;;  %s1395_s27 = smov 24  }
  0x50   : > { %1116 = vmatprep.subr.mxu0 %v1380_v0  ;;  %s1086_s18 = sshll.u32 %s1438_s16, 7  ;;  %s200_s20 = scalar_lea.vmem [#allocation7], %s1068_s21 }
  0x51   : > { %1117 = vmatpush3.msra.mxu0 %v202_v4  ;;  %p1667_p3 = scmp.ne.s32.totalorder %s1661_s6, 0  ;;  %s1396_s16 = smov [#allocation7]  }
  0x52   : > { %1119 = vmatmul.mubr.msk.f32.vlgmr.msra.gmra.mxu0 %vm213_vm1, %v201_v5  ;;  %1131 = vmatprep.subr.mxu0 %v1380_v0  ;;  %s1310_s21 = sshll.u32 %s1396_s16, 4  ;;  %s1311_s21 = int_to_ptr.vmem [resolvable:$false] %s1310_s21 }
  0x53   : > { %1133 = vmatprep.mubr.msk.f32.mxu0 %vm1381_vm0, %v1380_v0 }
 0x112   : > { %v283_v7 = vpop.f32.mrf.mxu0 }
 0x113   : > { %v1554_v8 = vadd.f32 %v1071_v6, %v283_v7 }
 0x114   : > { %v1120_v9 = vpop.f32.mrf.mxu0 }
 0x115   : > { %289 = vrot.lane.b32.xlu0 %v1554_v8, %s1382_s17  ;;  %v287_v10 = vmul.f32 0.35355338, %v1554_v8  ;;  %s981_s17 = sshll.u32 %s200_s20, 4  ;;  %s982_s17 = int_to_ptr.vmem [resolvable:$true] %s981_s17 }
 0x116   : > { %p1313_p10 = scmp.lt.s32.totalorder %s982_s17, %s1311_s21 }
 0x117   : > { %454 = vrot.lane.b32.xlu1 %v287_v10, %s1383_s22 }
 0x119   : > { %456 = vrot.lane.b32.xlu0 %v1554_v8, %s1384_s23 }
 0x11b   : > { %621 = vrot.lane.b32.xlu1 %v1554_v8, %s1385_s25  ;;  %s1610_s25 = scalar_lea.hbm %s1651_s3, %s1086_s18 }
 0x11d   : > { %619 = vrot.lane.b32.xlu0 %v287_v10, %s1386_s28  ;;  %s968_s28 = scalar_lea.sflag [#allocation4], %s1524_s11 }
 0x11f   : > { %786 = vrot.lane.b32.xlu1 %v1554_v8, %s1387_s29  ;;  %s1306_s29 = scalar_lea.vmem %s982_s17, 128 }
 0x120   : > { %p1307_p8 = scmp.ne.s32.totalorder %s982_s17, %s1306_s29 }
 0x121   : > { %784 = vrot.lane.b32.xlu0 %v287_v10, %s1388_s30  ;;  %s1312_s30 = scalar_lea.vmem %s1311_s21, 256 }
 0x122   : > { %p1308_p11 = pnand %p1307_p8, %p1667_p3  ;;  %p1314_p2 = scmp.lt.s32.totalorder %s1312_s30, %s1306_s29 }
 0x124   : > { %p1309_p7 = pneg %p1308_p11  ;;  %p1315_p13 = por %p1314_p2, %p1313_p10 }
 0x126   : > { %p1316_p0 = pnand %p1315_p13, %p1309_p7 }
 0x187   : > { %v290_v11 = vpop.permute.xlu0 %289 }
 0x188   : > { %1122 = vmatpush3.xpose.msk.msra.mxu1 %vm291_vm2, %v290_v11 }
 0x189   : > { %v455_v12 = vpop.permute.xlu1 %454  ;;  %1126 = vmatprep.subr.mxu1 %v1380_v0 }
 0x18b   : > { %v457_v13 = vpop.permute.xlu0 %456  ;;  %1124 = vmatmul.mubr.msk.f32.vlgmr.msra.gmra.mxu1 %vm291_vm2, %v287_v10 }
 0x18c   : > { %1132 = vmatpush3.xpose.msk.msra.mxu0 %vm291_vm2, %v457_v13  ;;  %1128 = vmatprep.mubr.msk.f32.mxu1 %vm1381_vm0, %v1380_v0 }
 0x18d   : > { %v622_v14 = vpop.permute.xlu1 %621  ;;  %1141 = vmatprep.subr.mxu0 %v1380_v0 }
 0x18f   : > { %1134 = vmatmul.mubr.msk.f32.vlgmr.msra.gmra.mxu0 %vm291_vm2, %v455_v12  ;;  %v620_v15 = vpop.permute.xlu0 %619 }
 0x190   : > { %1142 = vmatpush3.xpose.msk.msra.mxu0 %vm291_vm2, %v622_v14  ;;  %1143 = vmatprep.mubr.msk.f32.mxu0 %vm1381_vm0, %v1380_v0 }
 0x191   : > { %1151 = vmatprep.subr.mxu0 %v1380_v0  ;;  %v787_v16 = vpop.permute.xlu1 %786 }
 0x193   : > { %1144 = vmatmul.mubr.msk.f32.vlgmr.msra.gmra.mxu0 %vm291_vm2, %v620_v15  ;;  %v785_v17 = vpop.permute.xlu0 %784 }
 0x194   : > { %1152 = vmatpush3.xpose.msk.msra.mxu0 %vm291_vm2, %v787_v16  ;;  %1153 = vmatprep.mubr.msk.f32.mxu0 %vm1381_vm0, %v1380_v0 }
 0x197   : > { %1154 = vmatmul.mubr.msk.f32.vlgmr.msra.gmra.mxu0 %vm291_vm2, %v785_v17 }
 0x24b   : > { %v363_v18 = vpop.f32.mrf.mxu1 }
 0x24c   : > { %v367_v19 = vsel %vm291_vm2, %v363_v18, -inf }
 0x24d   : > { %368 = vmax.xlane.f32.xlu1 %v367_v19  ;;  %v1125_v20 = vpop.f32.mrf.mxu1 }
 0x24f   : > { %v528_v21 = vpop.f32.mrf.mxu0 }
 0x250   : > { %v532_v22 = vsel %vm291_vm2, %v528_v21, -inf }
 0x251   : > { %533 = vmax.xlane.f32.xlu0 %v532_v22  ;;  %v1135_v23 = vpop.f32.mrf.mxu0 }
 0x253   : > { %v693_v24 = vpop.f32.mrf.mxu0 }
 0x254   : > { %v697_v25 = vsel %vm291_vm2, %v693_v24, -inf }
 0x255   : > { %698 = vmax.xlane.f32.xlu0 %v697_v25  ;;  %v1145_v26 = vpop.f32.mrf.mxu0 }
 0x257   : > { %v858_v27 = vpop.f32.mrf.mxu0 }
 0x258   : > { %v862_v28 = vsel %vm291_vm2, %v858_v27, -inf }
 0x259   : > { %863 = vmax.xlane.f32.xlu1 %v862_v28  ;;  %v1155_v29 = vpop.f32.mrf.mxu0 }
 0x26a   : > { %543 = vrot.lane.b32.xlu1 %v1554_v8, %s1389_s4 }
 0x2d6   : > { %v369_v30 = vpop.xlane.xlu1 %368 }
 0x2d7   : > { %v370_v31 = vsub.f32 %v363_v18, %v369_v30 }
 0x2d9   : > { %v371_v32 = vmul.f32 1.442695, %v370_v31 }
 0x2da   : > { %v534_v33 = vpop.xlane.xlu0 %533 }
 0x2db   : > { %1236 = vpow2.f32 %v371_v32  ;;  %v535_v34 = vsub.f32 %v528_v21, %v534_v33 }
 0x2dd   : > { %v536_v35 = vmul.f32 1.442695, %v535_v34 }
 0x2de   : > { %v699_v45 = vpop.xlane.xlu0 %698 }
 0x2df   : > { %1238 = vpow2.f32 %v536_v35  ;;  %v700_v46 = vsub.f32 %v693_v24, %v699_v45 }
 0x2e1   : > { %v701_v47 = vmul.f32 1.442695, %v700_v46 }
 0x2e2   : > { %v864_v36 = vpop.xlane.xlu1 %863 }
 0x2e3   : > { %v865_v37 = vsub.f32 %v858_v27, %v864_v36 }
 0x2e5   : > { %v866_v38 = vmul.f32 1.442695, %v865_v37 }
 0x2e6   : > { %v544_v50 = vpop.permute.xlu1 %543 }
 0x2e7   : > { %1240 = vpow2.f32 %v866_v38 }
 0x2e8   : > { %v1237_v39 = vpop.eup %1236  ;;  %1242 = vpow2.f32 %v701_v47 }
 0x2e9   : > { %v373_v40 = vsel %vm291_vm2, %v1237_v39, 0.0 }
 0x2ea   : > { %374 = vadd.xlane.f32.xlu0 %v373_v40 }
 0x2ec   : > { %v1239_v41 = vpop.eup %1238 }
 0x2ed   : > { %v538_v42 = vsel %vm291_vm2, %v1239_v41, 0.0 }
 0x2ee   : > { %539 = vadd.xlane.f32.xlu1 %v538_v42 }
 0x2f4   : > { %v1241_v43 = vpop.eup %1240 }
 0x2f5   : > { %v868_v44 = vsel %vm291_vm2, %v1241_v43, 0.0  ;;  %v1243_v48 = vpop.eup %1242 }
 0x2f6   : > { %869 = vadd.xlane.f32.xlu1 %v868_v44  ;;  %v703_v49 = vsel %vm291_vm2, %v1243_v48, 0.0 }
 0x300   : > { %378 = vrot.lane.b32.xlu0 %v1554_v8, %s1390_s8 }
 0x307   : > { %708 = vrot.lane.b32.xlu1 %v1554_v8, %s1391_s7 }
 0x31f   : > { %704 = vadd.xlane.f32.xlu0 %v703_v49 }
 0x335   : > { %873 = vrot.lane.b32.xlu0 %v1554_v8, %s1392_s9 }
 0x373   : > { %v375_v51 = vpop.xlane.xlu0 %374 }
 0x374   : > { %1244 = vrcp.f32 %v375_v51 }
 0x377   : > { %v379_v52 = vpop.permute.xlu0 %378  ;;  %v540_v53 = vpop.xlane.xlu1 %539 }
 0x378   : > { %1246 = vrcp.f32 %v540_v53  ;;  %1127 = vmatpush3.msra.mxu1 %v379_v52 }
 0x379   : > { %1136 = vmatprep.subr.mxu1 %v1380_v0 }
 0x37f   : > { %v870_v55 = vpop.xlane.xlu1 %869 }
 0x381   : > { %v1245_v54 = vpop.eup %1244 }
 0x382   : > { %v377_v56 = vmul.f32 %v1245_v54, %v1237_v39 }
 0x383   : > { %v709_v59 = vpop.permute.xlu1 %708 }
 0x384   : > { %1129 = vmatmul.mubr.msk.f32.vlgmr.msra.gmra.mxu1 %vm291_vm2, %v377_v56 }
 0x385   : > { %v1247_v57 = vpop.eup %1246  ;;  %1137 = vmatpush3.msra.mxu1 %v544_v50  ;;  %1138 = vmatprep.mubr.msk.f32.mxu1 %vm1381_vm0, %v1380_v0 }
 0x386   : > { %1146 = vmatprep.subr.mxu1 %v1380_v0  ;;  %v542_v58 = vmul.f32 %v1247_v57, %v1239_v41 }
 0x388   : > { %1139 = vmatmul.mubr.msk.f32.vlgmr.msra.gmra.mxu1 %vm291_vm2, %v542_v58 }
 0x389   : > { %1147 = vmatpush3.msra.mxu1 %v709_v59  ;;  %1148 = vmatprep.mubr.msk.f32.mxu1 %vm1381_vm0, %v1380_v0 }
 0x38a   : > { %1156 = vmatprep.subr.mxu1 %v1380_v0 }
 0x3a8   : > { %v705_v60 = vpop.xlane.xlu0 %704 }
 0x3a9   : > { %1248 = vrcp.f32 %v705_v60 }
 0x3aa   : > { %1250 = vrcp.f32 %v870_v55 }
 0x3ac   : > { %v874_v1 = vpop.permute.xlu0 %873 }
 0x3b6   : > { %v1249_v61 = vpop.eup %1248 }
 0x3b7   : > { %v707_v62 = vmul.f32 %v1249_v61, %v1243_v48  ;;  %v1251_v63 = vpop.eup %1250 }
 0x3b8   : > { %v872_v2 = vmul.f32 %v1251_v63, %v1241_v43 }
 0x3b9   : > { %1149 = vmatmul.mubr.msk.f32.vlgmr.msra.gmra.mxu1 %vm291_vm2, %v707_v62 }
 0x3ba   : > { %1157 = vmatpush3.msra.mxu1 %v874_v1  ;;  %1158 = vmatprep.mubr.msk.f32.mxu1 %vm1381_vm0, %v1380_v0 }
 0x3bd   : > { %1159 = vmatmul.mubr.msk.f32.vlgmr.msra.gmra.mxu1 %vm291_vm2, %v872_v2 }
 0x444   : > { %v450_v3 = vpop.f32.mrf.mxu1 }
 0x446   : > { %v1130_v4 = vpop.f32.mrf.mxu1 }
 0x448   : > { %v615_v5 = vpop.f32.mrf.mxu1 }
 0x449   : > { %950 = vrot.lane.b32.xlu1 %v615_v5, %s1393_s10 }
 0x44a   : > { %v1140_v6 = vpop.f32.mrf.mxu1 }
 0x479   : > { %v780_v7 = vpop.f32.mrf.mxu1 }
 0x47a   : > { %954 = vrot.lane.b32.xlu0 %v780_v7, %s1394_s26 }
 0x47b   : > { %v1150_v8 = vpop.f32.mrf.mxu1 }
 0x47d   : > { %v945_v9 = vpop.f32.mrf.mxu1 }
 0x47e   : > { %958 = vrot.lane.b32.xlu1 %v945_v9, %s1395_s27 }
 0x47f   : > { %v1160_v0 = vpop.f32.mrf.mxu1 }
 0x4bb   : > { %v951_v10 = vpop.permute.xlu1 %950 }
 0x4bc   : > { %v961_v12 = vsel %vm291_vm2, %v450_v3, %v951_v10 }
 0x4ec   : > { %v955_v11 = vpop.permute.xlu0 %954 }
 0x4ed   : > { %v963_v13 = vsel %vm962_vm3, %v961_v12, %v955_v11 }
 0x4f0   : > { %v959_v14 = vpop.permute.xlu1 %958 }
 0x4f1   : > { %v965_v15 = vsel %vm964_vm4, %v963_v13, %v959_v14 }
 0x4f2   : > { %966 = vst.msk [vmem:[%s200_s20] sm:$0xff] %vm213_vm1, %v965_v15 }
 0x4f3   : > { %1319 = shalt.err (!%p1316_p0)
}
 0x4f4   : > { %s1320_s4 = scalar_lea.hbm %s1610_s25, 128  ;;  %s1324_s7 = scalar_lea.hbm %s1651_s3, 256 }
 0x4f5   : > { %p1321_p5 = scmp.ne.s32.totalorder %s1610_s25, %s1320_s4  ;;  %p1325_p1 = scmp.lt.s32.totalorder %s1610_s25, %s1651_s3 }
 0x4f6   : > { %p1326_p4 = scmp.lt.s32.totalorder %s1324_s7, %s1320_s4 }
 0x4f7   : > { %p1322_p9 = pnand %p1321_p5, %p1667_p3 }
 0x4f8   : > { %p1327_p6 = por %p1326_p4, %p1325_p1 }
 0x4f9   : > { %p1323_p12 = pneg %p1322_p9 }
 0x4fb   : > { %p1328_p8 = pnand %p1327_p6, %p1323_p12 }
 0x4fd   : > { %1331 = shalt.err (!%p1328_p8)
}
 0x4fe   : > { %1167 = dma.vmem_to_hbm [thread:$0]  (%p1667_p3), %s982_s17, 128, %s1610_s25, %s968_s28  }
 0x4ff PF: > { %s993_s26 = sand.u32 1, %s1362_s12   ;;  %p1668_p11 = scmp.ne.s32.totalorder %s1657_s19, 0 }
 0x500   : > { %p1669_p7 = scmp.ge.s32.totalorder %s1374_s15, 2  ;;  %s994_s27 = scalar_lea.sflag [#allocation4], %s993_s26 }
 0x502   : > { %p1178_p10 = pnand %p1669_p7, %p1668_p11 }
 0x504   : > { %p1179_p2 = pneg %p1178_p10 }
 0x506   : > { %1357 = dma.done.wait (%p1179_p2), %s994_s27, 128  }
 0x507   : > { %1359 = vsyncadd (%p1179_p2), %s994_s27, 4294967168  ;;  %p17_p13 = scmp.ge.s32.totalorder %s1471_s24, 4   ;;  %s1670_s12 = smov %s1366_s13 }
 0x508   : > { %s1671_s13 = smov %s1370_s14  ;;  %s1672_s14 = smov %s1488_s5 }
 0x509   : > { %s1673_s15 = smov %s1471_s24  ;;  %19 = sbr.rel (!%p17_p13) target bundleno = 6 (0x6), region = 81 }
 0x50e   :  { %999 = vsyncpa [#allocation3], 1 }
 0x50f   :  { %1001 = vsyncpa [#allocation3 + $0x1], 1 }
 0x510   :  { %1002 = vsyncpa [#allocation6], 1 }
 0x511   :  { %1003 = vsyncpa [#allocation4], 1 }
 0x512   :  { %1005 = vsyncpa [#allocation4 + $0x1], 1 }

</bundles_post_ra>
